<compile_context>
chip_gen: v7x
topology: tpu7x:2x2x1
jax: 0.10.0
libtpu: 0.0.40
codegen_flags: <defaults>
</compile_context>

<pallas_src>
import jax
import jax.numpy as jnp
from jax.experimental import pallas as pl
from jax.experimental.pallas import tpu as pltpu


def _temporal_glu_kernel(x_ref, w_ref, b_ref, o_ref):
    """x_ref: (RG, T*C_in); w_ref: (T*C_in, 2*W_pad); b_ref: (1, 2*W_pad);
    o_ref: (RG, T_out*C_out).  One fused MXU matmul + bias + GLU per block."""
    w_pad = w_ref.shape[-1] // 2          # lane-aligned per-branch width
    w_real = o_ref.shape[-1]              # un-padded width actually stored
    acc = jnp.dot(x_ref[...], w_ref[...], preferred_element_type=jnp.float32)
    acc = acc + b_ref[...]                # (1, 2*W_pad) broadcast over rows
    normal = acc[:, :w_pad]               # lane-aligned slices
    gate = acc[:, w_pad:]
    glu = normal * jax.nn.sigmoid(gate)
    o_ref[...] = glu[:, :w_real].astype(o_ref.dtype)


def _conv_matrix(w, t_in, t_out):
    """Dense temporal-conv matrix for Conv2d(C_in, C_out, (1, K)).

    Row index = t*C_in + c (input timestep/channel); col = s*C_out + o (output
    timestep/channel); entry = w[o, c, 0, t-s] when 0 <= t-s < K else 0.
    """
    c_out, c_in, _, k = w.shape
    wk = jnp.transpose(w[:, :, 0, :], (2, 1, 0))          # (K, C_in, C_out)
    m = jnp.zeros((t_in, c_in, t_out, c_out), w.dtype)
    s = jnp.arange(t_out)
    for kk in range(k):                                   # K is small & static
        m = m.at[s + kk, :, s, :].set(
            jnp.broadcast_to(wk[kk], (t_out, c_in, c_out)))
    return m.reshape(t_in * c_in, t_out * c_out)


def _choose_row_block(rows, cap):
    """Pick rows-per-block: multiple of 8 (or the whole array), preferably an
    exact divisor of `rows` (no padding, no post-slice) with an even grid
    (v7x has two TensorCores).  Returns (block_rows, padded_rows)."""
    cap = max(1, min(cap, rows))
    best = None
    for rg in range(cap, 0, -1):
        if rows % rg:
            continue
        if rg % 8 and rg != rows:
            continue
        if (rows // rg) % 2 == 0:
            return rg, rows                               # large block, even grid
        if best is None:
            best = rg
    if best is not None and best * 8 >= cap:
        return best, rows
    # No usable divisor (e.g. large prime row count): pad the rows instead.
    rg = max(8, (cap // 8) * 8)
    return rg, ((rows + rg - 1) // rg) * rg


def temporal_layer(x, w1, b1, w2, b2, *, matmul_dtype=None):
    """x: (B, N, T, C_in); w*: (C_out, C_in, 1, K) (PyTorch layout); b*: (C_out,)."""
    B, N, T, C_in = x.shape
    C_out, C_in_w, _, K = w1.shape
    assert C_in_w == C_in
    T_out = T - K + 1
    R = B * N
    W = T_out * C_out                                     # real per-branch width
    W_pad = ((W + 127) // 128) * 128                      # lane-aligned (VMEM only)

    # MXU input dtype.  Default keeps the given precision (no silent downcast
    # of the conv weights); pass jnp.bfloat16 to halve the x read on v6e/v7x
    # when the cast is free upstream.  Accumulation / bias / GLU stay f32.
    if matmul_dtype is None:
        mm_dtype = jnp.promote_types(x.dtype, w1.dtype)
    else:
        mm_dtype = jnp.dtype(matmul_dtype)

    # ---- branch-fused, lane-padded temporal-conv weight & bias ---------------
    m1 = _conv_matrix(w1, T, T_out)
    m2 = _conv_matrix(w2, T, T_out)
    wf = jnp.zeros((T * C_in, 2 * W_pad), mm_dtype)
    wf = wf.at[:, :W].set(m1.astype(mm_dtype))
    wf = wf.at[:, W_pad:W_pad + W].set(m2.astype(mm_dtype))
    bf = jnp.zeros((1, 2 * W_pad), jnp.float32)
    bf = bf.at[0, :W].set(jnp.tile(b1.astype(jnp.float32), T_out))
    bf = bf.at[0, W_pad:W_pad + W].set(jnp.tile(b2.astype(jnp.float32), T_out))

    # ---- activations: contiguous (free) reshape, no im2col -------------------
    x2 = x.reshape(R, T * C_in)
    if x2.dtype != mm_dtype:
        x2 = x2.astype(mm_dtype)
    out_dtype = x.dtype

    # ---- row-block sizing -----------------------------------------------------
    x_bytes = jnp.dtype(mm_dtype).itemsize
    o_bytes = jnp.dtype(out_dtype).itemsize
    weight_bytes = 2 * (T * C_in) * (2 * W_pad) * x_bytes + 2 * (2 * W_pad) * 4
    per_row = 2 * (T * C_in) * x_bytes + 2 * W * o_bytes + (2 * W_pad) * 4
    budget = 9 * 1024 * 1024 - weight_bytes               # under all default scoped VMEM
    cap = min(4096, max(8, budget // per_row))
    RG, R_pad = _choose_row_block(R, cap)
    if R_pad != R:
        # TODO(synk): only reached when R has no usable divisor; costs one extra
        # pad/slice pass over the activations.
        x2 = jnp.pad(x2, ((0, R_pad - R), (0, 0)))

    grid = (R_pad // RG,)
    flops = 2 * R_pad * (T * C_in) * (2 * W_pad) + 4 * R_pad * W_pad
    bytes_accessed = (R_pad * T * C_in * x_bytes
                      + (T * C_in) * 2 * W_pad * x_bytes
                      + 2 * W_pad * 4
                      + R_pad * W * o_bytes)

    out2 = pl.pallas_call(
        _temporal_glu_kernel,
        out_shape=jax.ShapeDtypeStruct((R_pad, W), out_dtype),
        grid=grid,
        in_specs=[
            pl.BlockSpec((RG, T * C_in), lambda i: (i, 0)),        # activations
            pl.BlockSpec((T * C_in, 2 * W_pad), lambda i: (0, 0)),  # resident fused weight
            pl.BlockSpec((1, 2 * W_pad), lambda i: (0, 0)),        # resident fused bias
        ],
        out_specs=pl.BlockSpec((RG, W), lambda i: (i, 0)),          # un-padded output
        compiler_params=pltpu.CompilerParams(
            dimension_semantics=("parallel",),
            vmem_limit_bytes=32 * 1024 * 1024,
        ),
        cost_estimate=pl.CostEstimate(
            flops=int(flops),
            transcendentals=int(R_pad * W_pad),
            bytes_accessed=int(bytes_accessed),
        ),
    )(x2, wf, bf)

    if R_pad != R:
        out2 = out2[:R]
    return out2.reshape(B, N, T_out, C_out)


def _reference(x, w1, b1, w2, b2):
    """Pure-JAX reference matching the PyTorch forward."""
    B, N, T, C_in = x.shape
    C_out, _, _, K = w1.shape
    T_out = T - K + 1
    idx = jnp.arange(T_out)[:, None] + jnp.arange(K)[None, :]      # (T_out, K)
    xw = x[:, :, idx, :]                                           # (B, N, T_out, K, C_in)
    normal = jnp.einsum('bntkc,ock->bnto', xw, w1[:, :, 0, :]) + b1
    gate = jax.nn.sigmoid(jnp.einsum('bntkc,ock->bnto', xw, w2[:, :, 0, :]) + b2)
    return normal * gate


if __name__ == "__main__":
    B, N, T = 2, 4, 16
    C_in, C_out, K = 4, 8, 3

    key = jax.random.PRNGKey(0)
    kx, kw1, kb1, kw2, kb2 = jax.random.split(key, 5)

    x = jax.random.normal(kx, (B, N, T, C_in), dtype=jnp.float32)

    # Deterministic init, same shapes as nn.Conv2d(C_in, C_out, (1, K)).
    fan_in = C_in * 1 * K
    bound = 1.0 / (fan_in ** 0.5)
    w1 = jax.random.uniform(kw1, (C_out, C_in, 1, K), jnp.float32, -bound, bound)
    b1 = jax.random.uniform(kb1, (C_out,), jnp.float32, -bound, bound)
    w2 = jax.random.uniform(kw2, (C_out, C_in, 1, K), jnp.float32, -bound, bound)
    b2 = jax.random.uniform(kb2, (C_out,), jnp.float32, -bound, bound)

    ref = _reference(x, w1, b1, w2, b2)

    # Default path: exact input precision.
    out = jax.block_until_ready(temporal_layer(x, w1, b1, w2, b2))
    assert out.shape == (B, N, T - K + 1, C_out), out.shape
    assert jnp.allclose(out, ref, atol=1e-4, rtol=1e-4), float(
        jnp.max(jnp.abs(out - ref)))

    # Optional bf16-MXU-input path (f32 accumulate) for v6e/v7x pipelines.
    out_bf16 = jax.block_until_ready(
        temporal_layer(x, w1, b1, w2, b2, matmul_dtype=jnp.bfloat16))
    assert jnp.allclose(out_bf16, ref, atol=2e-2, rtol=2e-2), float(
        jnp.max(jnp.abs(out_bf16 - ref)))

    print("KERNEL_OK")
</pallas_src>

<mosaic_0001>
module attributes {stable_mosaic.version = 11 : i64} {
  func.func @_temporal_glu_kernel(%arg0: i32, %arg1: memref<8x64xf32, #tpu.memory_space<vmem>>, %arg2: memref<64x256xf32, #tpu.memory_space<vmem>>, %arg3: memref<1x256xf32, #tpu.memory_space<vmem>>, %arg4: memref<8x112xf32, #tpu.memory_space<vmem>>) attributes {dimension_semantics = [#tpu.dimension_semantics<parallel>], iteration_bounds = array<i64: 1>, scalar_prefetch = 0 : i64, scratch_operands = 0 : i64, tpu.core_type = #tpu.core_type<tc>, window_params = [{transform_indices = @transform_0, window_bounds = array<i64: 8, 64>}, {pipeline_mode = #tpu.pipeline_mode<synchronous>, transform_indices = @transform_1, window_bounds = array<i64: 64, 256>}, {pipeline_mode = #tpu.pipeline_mode<synchronous>, transform_indices = @transform_2, window_bounds = array<i64: 1, 256>}, {transform_indices = @transform_3, window_bounds = array<i64: 8, 112>}]} {
    %c0 = arith.constant 0 : index
    %c0_0 = arith.constant 0 : index
    %0 = vector.load %arg1[%c0, %c0_0] : memref<8x64xf32, #tpu.memory_space<vmem>>, vector<8x64xf32>
    %c0_1 = arith.constant 0 : index
    %c0_2 = arith.constant 0 : index
    %1 = vector.load %arg2[%c0_1, %c0_2] : memref<64x256xf32, #tpu.memory_space<vmem>>, vector<64x256xf32>
    %cst = arith.constant dense<0.000000e+00> : vector<8x256xf32>
    %2 = tpu.matmul %0, %1, %cst {dimension_numbers = #tpu.dot_dimension_numbers<[1], [0], [0], [1], [0, 0, 1, 1], [], []>} : vector<8x64xf32>, vector<64x256xf32>, vector<8x256xf32> -> vector<8x256xf32>
    %c0_3 = arith.constant 0 : index
    %c0_4 = arith.constant 0 : index
    %3 = vector.load %arg3[%c0_3, %c0_4] : memref<1x256xf32, #tpu.memory_space<vmem>>, vector<1x256xf32>
    %4 = vector.broadcast %3 : vector<1x256xf32> to vector<8x256xf32>
    %5 = arith.addf %2, %4 : vector<8x256xf32>
    %6 = vector.extract_strided_slice %5 {offsets = [0, 0], sizes = [8, 128], strides = [1, 1]} : vector<8x256xf32> to vector<8x128xf32>
    %7 = vector.extract_strided_slice %5 {offsets = [0, 128], sizes = [8, 128], strides = [1, 1]} : vector<8x256xf32> to vector<8x128xf32>
    %8 = arith.negf %7 : vector<8x128xf32>
    %9 = math.exp %8 : vector<8x128xf32>
    %cst_5 = arith.constant 1.000000e+00 : f32
    %10 = vector.broadcast %cst_5 : f32 to vector<8x128xf32>
    %11 = arith.addf %10, %9 : vector<8x128xf32>
    %12 = arith.divf %10, %11 : vector<8x128xf32>
    %13 = arith.mulf %6, %12 : vector<8x128xf32>
    %14 = vector.extract_strided_slice %13 {offsets = [0, 0], sizes = [8, 112], strides = [1, 1]} : vector<8x128xf32> to vector<8x112xf32>
    %c0_6 = arith.constant 0 : index
    %c0_7 = arith.constant 0 : index
    %15 = vector.load %arg4[%c0_6, %c0_7] : memref<8x112xf32, #tpu.memory_space<vmem>>, vector<8x112xf32>
    tpu.vector_store %arg4[%c0_6, %c0_7], %14 {strides = array<i32>} : memref<8x112xf32, #tpu.memory_space<vmem>>, vector<8x112xf32>,
    return
  }
  func.func @transform_0(%arg0: i32) -> (i32, i32) {
    %c0_i32 = arith.constant 0 : i32
    %c0_i32_0 = arith.constant 0 : i32
    return %arg0, %c0_i32 : i32, i32
  }
  func.func @transform_1(%arg0: i32) -> (i32, i32) {
    %c0_i32 = arith.constant 0 : i32
    %c0_i32_0 = arith.constant 0 : i32
    %c0_i32_1 = arith.constant 0 : i32
    return %c0_i32, %c0_i32_0 : i32, i32
  }
  func.func @transform_2(%arg0: i32) -> (i32, i32) {
    %c0_i32 = arith.constant 0 : i32
    %c0_i32_0 = arith.constant 0 : i32
    %c0_i32_1 = arith.constant 0 : i32
    return %c0_i32, %c0_i32_0 : i32, i32
  }
  func.func @transform_3(%arg0: i32) -> (i32, i32) {
    %c0_i32 = arith.constant 0 : i32
    %c0_i32_0 = arith.constant 0 : i32
    return %arg0, %c0_i32 : i32, i32
  }
}

</mosaic_0001>

<bundles_post_ra>
// kernel: tpu_custom_call.1
= control target key start
LH: loop header
LB: loop body
LE: loop exit
PB: predicated region body
PF: predicated region fallthrough
CT: control target
= control target key end

     0   :  { %8 = vsyncpa [#allocation3], 0  ;;  %s342_s0 = inlined_call_operand.hbm [shape: f32[8,64], index: 0, kind: input, shape index: {}]   ;;  %s343_s1 = inlined_call_operand.hbm [shape: f32[64,256], index: 1, kind: input, shape index: {}]   ;;  %s344_s2 = inlined_call_operand.vmem [shape: f32[1,256], index: 2, kind: input, shape index: {}]   ;;  %s345_s3 = inlined_call_operand.hbm [shape: f32[8,112], index: 3, kind: output, shape index: {}]  }
   0x1   :  { %9 = vsyncpa [#allocation6], 0 }
   0x2   :  { %10 = vsyncpa [#allocation4], 0  ;;  %s270_s12 = smov [#allocation2]   ;;  %s271_s14 = smov [#allocation5]  }
   0x3   :  { %s17_s13 = sshll.u32 %s270_s12, 4  ;;  %s26_s15 = sshll.u32 %s271_s14, 4  ;;  %s18_s13 = int_to_ptr.vmem [resolvable:$true] %s17_s13  ;;  %s296_s15 = int_to_ptr.vmem [resolvable:$true] %s26_s15 }
   0x4   :  { %s198_s18 = scalar_lea.hbm %s342_s0, 128 }
   0x5   :  { %p199_p0 = scmp.ne.s32.totalorder %s342_s0, %s198_s18  ;;  %p202_p1 = scmp.lt.u32.totalorder %s198_s18, %s342_s0 }
   0x7   :  { %p204_p2 = pnand %p202_p1, %p199_p0 }
   0x9   :  { %207 = shalt.err (!%p204_p2)
}
   0xa   :  { %s208_s23 = scalar_lea.vmem %s18_s13, 128  ;;  %p213_p4 = scmp.lt.s32.totalorder %s18_s13, %s18_s13 }
   0xb   :  { %p209_p3 = scmp.ne.s32.totalorder %s18_s13, %s208_s23  ;;  %p214_p5 = scmp.lt.s32.totalorder %s208_s23, %s208_s23 }
   0xd   :  { %p215_p6 = por %p214_p5, %p213_p4 }
   0xf   :  { %p216_p7 = pnand %p215_p6, %p209_p3 }
  0x11   :  { %219 = shalt.err (!%p216_p7)
}
  0x12   :  { %20 = dma.hbm_to_vmem [thread:$0]  %s342_s0, 128, %s18_s13, [#allocation3]  }
  0x13   :  { %s220_s28 = scalar_lea.hbm %s343_s1, 2048 }
  0x14   :  { %p221_p8 = scmp.ne.s32.totalorder %s343_s1, %s220_s28  ;;  %p224_p9 = scmp.lt.u32.totalorder %s220_s28, %s343_s1 }
  0x16   :  { %p226_p10 = pnand %p224_p9, %p221_p8 }
  0x18   :  { %229 = shalt.err (!%p226_p10)
}
  0x19   :  { %s230_s6 = scalar_lea.vmem %s296_s15, 2048  ;;  %p235_p12 = scmp.lt.s32.totalorder %s296_s15, %s296_s15 }
  0x1a   :  { %p231_p11 = scmp.ne.s32.totalorder %s296_s15, %s230_s6  ;;  %p236_p13 = scmp.lt.s32.totalorder %s230_s6, %s230_s6 }
  0x1c   :  { %p237_p0 = por %p236_p13, %p235_p12 }
  0x1e   :  { %p238_p1 = pnand %p237_p0, %p231_p11 }
  0x20   :  { %241 = shalt.err (!%p238_p1)
}
  0x21   :  { %s272_s0 = smov 256   ;;  %s273_s7 = smov 16  }
  0x22   :  { %32 = dma.hbm_to_vmem [thread:$0]  %s343_s1, 2048, %s296_s15, [#allocation6], %s272_s0, %s272_s0, %s273_s7  }
  0x23   :  { %264 = dma.done.wait [#allocation3], 128  }
  0x24   :  { %265 = vsyncadd [#allocation3], 4294967168 }
  0x25   :  { %266 = dma.done.wait [#allocation6], 2048  }
  0x26   :  { %267 = vsyncadd [#allocation6], 4294965248  ;;  %v274_v0 = vmov 0.0   ;;  %v43_v1 = vld [vmem:[#allocation5 + $0x8] sm:$0xff]  ;;  %v45_v2 = vld [vmem:[#allocation5 + $0x18] sm:$0xff]  ;;  %vm70_vm0 = vcmask 523264   ;;  %v60_v26 = vlaneseq }
  0x27   :  { %138 = vmatprep.mubr.f32.mxu0 %v274_v0  ;;  %v42_v3 = vld [vmem:[#allocation5] sm:$0xff]  ;;  %v172_v4 = vpack.c.bf16 %v45_v2, %v43_v1  ;;  %v44_v5 = vld [vmem:[#allocation5 + $0x10] sm:$0xff]  ;;  %v47_v6 = vld [vmem:[#allocation5 + $0x28] sm:$0xff]  ;;  %s275_s11 = smov [#allocation7]   ;;  %vm152_vm1 = vcmask 916480  }
  0x28   :  { %v49_v7 = vld [vmem:[#allocation5 + $0x38] sm:$0xff]  ;;  %v174_v8 = vpack.c.bf16 %v44_v5, %v42_v3  ;;  %v46_v10 = vld [vmem:[#allocation5 + $0x20] sm:$0xff]  ;;  %v48_v11 = vld [vmem:[#allocation5 + $0x30] sm:$0xff]  ;;  %v61_v27 = vshrl.u32 %v60_v26, 7  ;;  %s160_s12 = sshll.u32 %s275_s11, 4  ;;  %s161_s12 = int_to_ptr.vmem [resolvable:$true] %s160_s12 }
  0x29   :  { %v176_v9 = vpack.c.bf16 %v49_v7, %v47_v6  ;;  %v51_v12 = vld [vmem:[#allocation5 + $0x48] sm:$0xff]  ;;  %173 = vmatprep.subr.bf16.mxu0 %v172_v4  ;;  %v53_v13 = vld [vmem:[#allocation5 + $0x58] sm:$0xff]  ;;  %v178_v14 = vpack.c.bf16 %v48_v11, %v46_v10  ;;  %v50_v16 = vld [vmem:[#allocation5 + $0x40] sm:$0xff]  ;;  %p247_p3 = scmp.lt.s32.totalorder %s161_s12, %s161_s12 }
  0x2a   :  { %175 = vmatpush1.bf16.msra.mxu0 %v174_v8  ;;  %v180_v15 = vpack.c.bf16 %v53_v13, %v51_v12  ;;  %v52_v17 = vld [vmem:[#allocation5 + $0x50] sm:$0xff]  ;;  %v55_v18 = vld [vmem:[#allocation5 + $0x68] sm:$0xff]  ;;  %v57_v19 = vld [vmem:[#allocation5 + $0x78] sm:$0xff]  ;;  %v66_v28 = vsub.s32 1, %v61_v27  ;;  %v62_v37 = vsub.s32 0, %v61_v27 }
  0x2b   :  { %177 = vmatprep.subr.bf16.mxu0 %v176_v9  ;;  %v182_v20 = vpack.c.bf16 %v52_v17, %v50_v16  ;;  %v184_v21 = vpack.c.bf16 %v57_v19, %v55_v18  ;;  %v54_v22 = vld [vmem:[#allocation5 + $0x60] sm:$0xff]  ;;  %v56_v23 = vld [vmem:[#allocation5 + $0x70] sm:$0xff]  ;;  %v41_v25 = vld [vmem:[#allocation2] sm:$0xff] }
  0x2c   :  { %v186_v24 = vpack.c.bf16 %v56_v23, %v54_v22  ;;  %v58_v29 = vld [vmem:[%s344_s2] sm:$0x3]  ;;  %s242_s2 = scalar_lea.vmem %s161_s12, 128 }
  0x2d   :  { %v67_v30 = vrot.slane %v58_v29, %v66_v28  ;;  %v63_v38 = vrot.slane %v58_v29, %v62_v37  ;;  %p243_p2 = scmp.ne.s32.totalorder %s161_s12, %s242_s2  ;;  %p248_p4 = scmp.lt.s32.totalorder %s242_s2, %s242_s2 }
  0x2e   :  { %179 = vmatpush1.bf16.msra.mxu0 %v178_v14 }
  0x2f   :  { %181 = vmatprep.subr.bf16.mxu0 %v180_v15  ;;  %p249_p5 = por %p248_p4, %p247_p3 }
  0x31   :  { %p250_p6 = pnand %p249_p5, %p243_p2 }
  0x32   :  { %183 = vmatpush1.bf16.msra.mxu0 %v182_v20 }
  0x33   :  { %185 = vmatprep.subr.bf16.mxu0 %v184_v21 }
  0x36   :  { %187 = vmatpush1.bf16.msra.mxu0 %v186_v24 }
  0x39   :  { %170 = vmatmul.mubr.msk.f32.vlgmr.msra.gmra.mrb[0].mxu0 %vm70_vm0, %v41_v25 }
 0x10c   :  { %v140_v31 = vpop.f32.mrb[0].mxu0 }
 0x10d   :  { %v142_v32 = vpop.f32.mrb[1].mxu0  ;;  %v141_v39 = vadd.f32 %v140_v31, %v63_v38 }
 0x10e   :  { %v143_v33 = vadd.f32 %v142_v32, %v67_v30 }
 0x110   :  { %v171_v34 = vmul.f32 -1.442695, %v143_v33 }
 0x112   :  { %194 = vpow2.f32 %v171_v34 }
 0x11c   :  { %v195_v35 = vpop.eup %194 }
 0x11d   :  { %v148_v36 = vadd.f32 1.0, %v195_v35 }
 0x11f   :  { %196 = vrcp.f32 %v148_v36 }
 0x129   :  { %v197_v40 = vpop.eup %196 }
 0x12a   :  { %v151_v41 = vmul.f32 %v197_v40, %v141_v39 }
 0x12c   :  { %153 = vst.msk [vmem:[#allocation7] sm:$0xff] %vm152_vm1, %v151_v41 }
 0x12d   :  { %253 = shalt.err (!%p250_p6)
}
 0x12e   :  { %s254_s15 = scalar_lea.hbm %s345_s3, 128 }
 0x12f   :  { %p255_p7 = scmp.ne.s32.totalorder %s345_s3, %s254_s15  ;;  %p258_p8 = scmp.lt.u32.totalorder %s254_s15, %s345_s3 }
 0x131   :  { %p260_p9 = pnand %p258_p8, %p255_p7 }
 0x133   :  { %263 = shalt.err (!%p260_p9)
}
 0x134   :  { %163 = dma.vmem_to_hbm [thread:$0]  %s161_s12, 128, %s345_s3, [#allocation4]  }
 0x135   :  { %268 = dma.done.wait [#allocation4], 128  }
 0x136   :  { %269 = vsyncadd [#allocation4], 4294967168 }
 0x137   :  { %167 = vsyncpa [#allocation3], 1 }
 0x138   :  { %168 = vsyncpa [#allocation6], 1 }
 0x139   :  { %169 = vsyncpa [#allocation4], 1 }

</bundles_post_ra>
